<compile_context>
chip_gen: v5e
topology: v5e:2x2
jax: 0.10.0
libtpu: 0.0.40
codegen_flags: <defaults>
</compile_context>

<pallas_src>
import functools
import math

import jax
import jax.numpy as jnp
from jax import lax
from jax.experimental import pallas as pl
from jax.experimental.pallas import tpu as pltpu

NUM_CLASSES = 2
LANES = 128          # lane-dense output width (multiple of 128 -> unmasked vst)
ROW_TILE = 512       # adj row tile (sublane axis); ~85% of HBM roofline measured
K_TILE = 2048        # adj reduction tile (lane axis); sweep {1024, 2048, 4096}
SUP_DTYPE = jnp.bfloat16   # storage dtype for support_h (MXU input)


def _round_up(x, m):
    return ((x + m - 1) // m) * m


def _vmem_cap_bytes():
    """Generation-aware VMEM budget: physical capacity minus headroom."""
    headroom = 16 << 20
    try:
        cap = int(pltpu.get_tpu_info().vmem_capacity_bytes) - headroom
    except Exception:
        cap = (64 << 20) - headroom      # conservative (v7x-sized) fallback
    return max(cap, 16 << 20)


# --------------------------------------------------------------------------
# Kernel 1: support_h = (X @ Wgc) @ W1^T   (fc1 folded into the node features)
# --------------------------------------------------------------------------
def support_kernel(x_ref, wgc_ref, w1t_ref, out_ref):
    s = jnp.dot(x_ref[...], wgc_ref[...], preferred_element_type=jnp.float32)
    sh = jnp.dot(s, w1t_ref[...], preferred_element_type=jnp.float32)
    out_ref[...] = sh.astype(out_ref.dtype)


# --------------------------------------------------------------------------
# Kernel 2: K-tiled  adj @ support_h  accumulation + fused epilogue
#   (folded fc1 bias + relu  ->  fc2  ->  masked log_softmax, first 2 lanes)
# --------------------------------------------------------------------------
def gcn5_fused_kernel(adj_ref, sup_ref, bh_ref, w2_ref, b2_ref, out_ref,
                      acc_ref, *, n_cols, tk):
    k = pl.program_id(1)

    @pl.when(k == 0)
    def _init():
        acc_ref[...] = jnp.zeros_like(acc_ref)

    adj = adj_ref[...]
    if n_cols % tk != 0:
        # Ragged K edge: columns >= n_cols in the last block are out-of-bounds
        # garbage from the partial DMA -> zero them so they contribute nothing
        # to the accumulator (support_h rows beyond n_cols are exact zeros).
        col = lax.broadcasted_iota(jnp.int32, adj.shape, 1)
        adj = jnp.where(col < (n_cols - k * tk), adj, 0.0)
    acc_ref[...] += jnp.dot(adj.astype(jnp.bfloat16), sup_ref[...],
                            preferred_element_type=jnp.float32)

    @pl.when(k == pl.num_programs(1) - 1)
    def _epilogue():
        h = jnp.maximum(acc_ref[...] + bh_ref[...], 0.0)          # fc1 + relu
        z = jnp.dot(h, w2_ref[...],
                    preferred_element_type=jnp.float32) + b2_ref[...]
        lane = lax.broadcasted_iota(jnp.int32, z.shape, 1)
        valid = lane < NUM_CLASSES
        zmax = jnp.max(jnp.where(valid, z, -jnp.inf), axis=1, keepdims=True)
        ez = jnp.where(valid, jnp.exp(z - zmax), 0.0)
        lse = jnp.log(jnp.sum(ez, axis=1, keepdims=True))
        # Lanes >= NUM_CLASSES and rows >= N hold finite garbage; the wrapper
        # slices [:N, :NUM_CLASSES].
        out_ref[...] = ((z - zmax) - lse).astype(out_ref.dtype)


# --------------------------------------------------------------------------
# Wrapper
# --------------------------------------------------------------------------
def gcn5_forward(inputs, adj, params):
    """inputs: [N, in_dim] f32, adj: [N, N] f32 -> log-probs [N, 2] f32."""
    wgc, bgc, w1, b1, w2, b2 = params
    N, in_dim = inputs.shape
    D = wgc.shape[1]          # GraphConvolution out_features
    H = w1.shape[0]           # fc1 hidden width (32)

    # ---- tiling of the adj stream (the HBM-dominant read) -----------------
    if N < 128:
        # Tiny graph: pad once (negligible traffic), single aligned block.
        tm, tk = _round_up(N, 8), 128
        grid_m = grid_k = 1
        adj_in = jnp.pad(adj, ((0, tm - N), (0, tk - N))).astype(jnp.bfloat16)
        n_cols = tk                 # padded columns are exact zeros -> no mask
    else:
        # Large graph: stream adj unpadded in f32 (no pad/cast pre-pass).
        tm = min(ROW_TILE, (N // 8) * 8)
        grid_m = pl.cdiv(N, tm)
        if N >= 256 and grid_m % 2 == 1:
            # Keep an even number of row tiles so the two v7x TensorCores get
            # balanced work ("parallel" row axis is megacore-sharded).
            tm = _round_up(pl.cdiv(N, grid_m + 1), 8)
            grid_m = pl.cdiv(N, tm)
        tk = min(K_TILE, max(128, (N // 128) * 128))
        grid_k = pl.cdiv(N, tk)
        adj_in = adj
        n_cols = N
    r_pad = grid_m * tm
    k_pad = grid_k * tk
    cap = _vmem_cap_bytes()

    # ---- weight prep (PyTorch Linear stores [out, in] -> pre-transpose) ----
    wgc_f = wgc.astype(jnp.float32)
    w1t = w1.T.astype(jnp.float32)                               # (D, H)
    bias_h = (bgc.reshape(1, D).astype(jnp.float32) @ w1t
              + b1.reshape(1, H).astype(jnp.float32))            # (1, H)
    w2_pad = jnp.zeros((H, LANES), jnp.float32).at[:, :NUM_CLASSES].set(
        w2.T.astype(jnp.float32))                                # (H, 128)
    b2_pad = jnp.zeros((1, LANES), jnp.float32).at[:, :NUM_CLASSES].set(
        b2.astype(jnp.float32))

    # ---- kernel 1: support_h over k_pad zero-padded rows (run once) --------
    tms = min(512, k_pad)
    s_pad = pl.cdiv(k_pad, tms) * tms
    x_p = jnp.pad(inputs.astype(jnp.float32), ((0, s_pad - N), (0, 0)))
    vmem_sup = int(min(max(
        2 * tms * in_dim * 4 + 2 * (in_dim * D + D * H) * 4
        + 2 * tms * H * 2 + tms * D * 4 + (2 << 20),
        16 << 20), cap))
    support_h = pl.pallas_call(
        support_kernel,
        out_shape=jax.ShapeDtypeStruct((s_pad, H), SUP_DTYPE),
        grid=(s_pad // tms,),
        in_specs=[
            pl.BlockSpec((tms, in_dim), lambda i: (i, 0)),
            pl.BlockSpec((in_dim, D), lambda i: (0, 0)),
            pl.BlockSpec((D, H), lambda i: (0, 0)),
        ],
        out_specs=pl.BlockSpec((tms, H), lambda i: (i, 0)),
        compiler_params=pltpu.CompilerParams(
            dimension_semantics=("parallel",),
            vmem_limit_bytes=vmem_sup),
    )(x_p, wgc_f, w1t)

    # ---- kernel 2: fused GraphConv accumulate + MLP head + log_softmax -----
    vmem_needed = (2 * tm * tk * adj_in.dtype.itemsize   # dbl-buffered adj tile
                   + 2 * tk * H * 2                       # streamed support_h
                   + 2 * tm * LANES * 2                   # bf16 output slab
                   + tm * H * 4                           # f32 accumulator
                   + 2 * (H + H * LANES + LANES) * 4      # resident small params
                   + (2 << 20))                           # headroom
    vmem_limit = int(min(max(vmem_needed, 16 << 20), cap))

    kernel = functools.partial(gcn5_fused_kernel, n_cols=n_cols, tk=tk)
    out = pl.pallas_call(
        kernel,
        out_shape=jax.ShapeDtypeStruct((r_pad, LANES), jnp.bfloat16),
        grid=(grid_m, grid_k),
        in_specs=[
            pl.BlockSpec((tm, tk), lambda i, k: (i, k)),     # adj (streamed)
            pl.BlockSpec((tk, H), lambda i, k: (k, 0)),      # support_h (K-tiled)
            pl.BlockSpec((1, H), lambda i, k: (0, 0)),       # folded fc1 bias
            pl.BlockSpec((H, LANES), lambda i, k: (0, 0)),   # fc2 W^T (padded)
            pl.BlockSpec((1, LANES), lambda i, k: (0, 0)),   # fc2 b (padded)
        ],
        out_specs=pl.BlockSpec((tm, LANES), lambda i, k: (i, 0)),
        scratch_shapes=[pltpu.VMEM((tm, H), jnp.float32)],
        compiler_params=pltpu.CompilerParams(
            dimension_semantics=("parallel", "arbitrary"),
            vmem_limit_bytes=vmem_limit),
    )(adj_in, support_h, bias_h, w2_pad, b2_pad)

    return out[:N, :NUM_CLASSES].astype(jnp.float32)


# --------------------------------------------------------------------------
# Parameter init (mimics the PyTorch module's parameter shapes) + reference
# --------------------------------------------------------------------------
def init_params(key, in_dim, out_dim):
    ks = jax.random.split(key, 6)
    stdv = 1.0 / math.sqrt(out_dim)
    wgc = jax.random.uniform(ks[0], (in_dim, out_dim), jnp.float32, -stdv, stdv)
    bgc = jax.random.uniform(ks[1], (out_dim,), jnp.float32, -stdv, stdv)
    s1 = 1.0 / math.sqrt(out_dim)
    w1 = jax.random.uniform(ks[2], (32, out_dim), jnp.float32, -s1, s1)
    b1 = jax.random.uniform(ks[3], (32,), jnp.float32, -s1, s1)
    s2 = 1.0 / math.sqrt(32)
    w2 = jax.random.uniform(ks[4], (NUM_CLASSES, 32), jnp.float32, -s2, s2)
    b2 = jax.random.uniform(ks[5], (NUM_CLASSES,), jnp.float32, -s2, s2)
    return wgc, bgc, w1, b1, w2, b2


def reference_forward(inputs, adj, params):
    """Pure-JAX f32 reference for verification."""
    wgc, bgc, w1, b1, w2, b2 = params
    logits = adj @ (inputs @ wgc) + bgc
    h = jnp.maximum(logits @ w1.T + b1, 0.0)
    z = h @ w2.T + b2
    return jax.nn.log_softmax(z, axis=1)


if __name__ == "__main__":
    root = jax.random.PRNGKey(0)
    k_small, k_big = jax.random.split(root, 2)

    def make_case(key, n, in_dim, out_dim):
        k_x, k_a, k_p = jax.random.split(key, 3)
        inputs = jax.random.normal(k_x, (n, in_dim), jnp.float32)
        a_raw = jax.random.uniform(k_a, (n, n), jnp.float32)
        adj = (a_raw + a_raw.T) * 0.5 + jnp.eye(n, dtype=jnp.float32)
        adj = adj / jnp.sum(adj, axis=1, keepdims=True)   # row-normalized, f32
        params = init_params(k_p, in_dim, out_dim)
        return inputs, adj, params

    # Small case (padded single-block path): N=8, in_dim=16, out_dim=32.
    inputs, adj, params = make_case(k_small, 8, 16, 32)
    out = jax.block_until_ready(gcn5_forward(inputs, adj, params))
    ref = reference_forward(inputs, adj, params)
    assert out.shape == (8, NUM_CLASSES)
    assert jnp.allclose(out, ref, atol=2e-2, rtol=2e-2), "small-case mismatch"

    # Larger case exercising the unpadded ragged row/K-tiled streaming path
    # (grid_m=4 even row tiles, grid_k=2 with in-kernel K-edge masking).
    inputs2, adj2, params2 = make_case(k_big, 1030, 16, 32)
    out2 = jax.block_until_ready(gcn5_forward(inputs2, adj2, params2))
    ref2 = reference_forward(inputs2, adj2, params2)
    assert out2.shape == (1030, NUM_CLASSES)
    assert jnp.allclose(out2, ref2, atol=2e-2, rtol=2e-2), "tiled-case mismatch"

    print("KERNEL_OK")
</pallas_src>

<mosaic_0001>
module attributes {stable_mosaic.version = 11 : i64} {
  func.func @support_kernel(%arg0: i32, %arg1: memref<128x16xf32, #tpu.memory_space<vmem>>, %arg2: memref<16x32xf32, #tpu.memory_space<vmem>>, %arg3: memref<32x32xf32, #tpu.memory_space<vmem>>, %arg4: memref<128x32xbf16, #tpu.memory_space<vmem>>) attributes {dimension_semantics = [#tpu.dimension_semantics<parallel>], iteration_bounds = array<i64: 1>, scalar_prefetch = 0 : i64, scratch_operands = 0 : i64, tpu.core_type = #tpu.core_type<tc>, window_params = [{transform_indices = @transform_0, window_bounds = array<i64: 128, 16>}, {pipeline_mode = #tpu.pipeline_mode<synchronous>, transform_indices = @transform_1, window_bounds = array<i64: 16, 32>}, {pipeline_mode = #tpu.pipeline_mode<synchronous>, transform_indices = @transform_2, window_bounds = array<i64: 32, 32>}, {transform_indices = @transform_3, window_bounds = array<i64: 128, 32>}]} {
    %c0 = arith.constant 0 : index
    %c0_0 = arith.constant 0 : index
    %0 = vector.load %arg1[%c0, %c0_0] : memref<128x16xf32, #tpu.memory_space<vmem>>, vector<128x16xf32>
    %c0_1 = arith.constant 0 : index
    %c0_2 = arith.constant 0 : index
    %1 = vector.load %arg2[%c0_1, %c0_2] : memref<16x32xf32, #tpu.memory_space<vmem>>, vector<16x32xf32>
    %cst = arith.constant dense<0.000000e+00> : vector<128x32xf32>
    %2 = tpu.matmul %0, %1, %cst {dimension_numbers = #tpu.dot_dimension_numbers<[1], [0], [0], [1], [0, 0, 1, 1], [], []>} : vector<128x16xf32>, vector<16x32xf32>, vector<128x32xf32> -> vector<128x32xf32>
    %c0_3 = arith.constant 0 : index
    %c0_4 = arith.constant 0 : index
    %3 = vector.load %arg3[%c0_3, %c0_4] : memref<32x32xf32, #tpu.memory_space<vmem>>, vector<32x32xf32>
    %cst_5 = arith.constant dense<0.000000e+00> : vector<128x32xf32>
    %4 = tpu.matmul %2, %3, %cst_5 {dimension_numbers = #tpu.dot_dimension_numbers<[1], [0], [0], [1], [0, 0, 1, 1], [], []>} : vector<128x32xf32>, vector<32x32xf32>, vector<128x32xf32> -> vector<128x32xf32>
    %5 = arith.truncf %4 : vector<128x32xf32> to vector<128x32xbf16>
    %c0_6 = arith.constant 0 : index
    %c0_7 = arith.constant 0 : index
    %6 = vector.load %arg4[%c0_6, %c0_7] : memref<128x32xbf16, #tpu.memory_space<vmem>>, vector<128x32xbf16>
    tpu.vector_store %arg4[%c0_6, %c0_7], %5 {strides = array<i32>} : memref<128x32xbf16, #tpu.memory_space<vmem>>, vector<128x32xbf16>,
    return
  }
  func.func @transform_0(%arg0: i32) -> (i32, i32) {
    %c0_i32 = arith.constant 0 : i32
    %c0_i32_0 = arith.constant 0 : i32
    return %arg0, %c0_i32 : i32, i32
  }
  func.func @transform_1(%arg0: i32) -> (i32, i32) {
    %c0_i32 = arith.constant 0 : i32
    %c0_i32_0 = arith.constant 0 : i32
    %c0_i32_1 = arith.constant 0 : i32
    return %c0_i32, %c0_i32_0 : i32, i32
  }
  func.func @transform_2(%arg0: i32) -> (i32, i32) {
    %c0_i32 = arith.constant 0 : i32
    %c0_i32_0 = arith.constant 0 : i32
    %c0_i32_1 = arith.constant 0 : i32
    return %c0_i32, %c0_i32_0 : i32, i32
  }
  func.func @transform_3(%arg0: i32) -> (i32, i32) {
    %c0_i32 = arith.constant 0 : i32
    %c0_i32_0 = arith.constant 0 : i32
    return %arg0, %c0_i32 : i32, i32
  }
}

</mosaic_0001>

<bundles_post_ra>
// kernel: tpu_custom_call.1
= control target key start
LH: loop header
LB: loop body
LE: loop exit
PB: predicated region body
PF: predicated region fallthrough
CT: control target
= control target key end

     0   :  { %vm32_vm0 = vcmask 130048   ;;  %vm150_vm1 = vcmask 261120   ;;  %vm280_vm2 = vcmask 257024   ;;  %s521_s1 = inlined_call_operand.vmem [shape: f32[16,32], index: 1, kind: input, shape index: {}]   ;;  %s522_s0 = inlined_call_operand.vmem [shape: f32[128,16], index: 0, kind: input, shape index: {}]   ;;  %s523_s2 = inlined_call_operand.vmem [shape: f32[32,32], index: 2, kind: input, shape index: {}]   ;;  %s524_s3 = inlined_call_operand.vmem [shape: bf16[128,32], index: 3, kind: output, shape index: {}]  }
   0x1   :  { %v31_v0 = vld [vmem:[%s521_s1 + $0x8] sm:$0xff]  ;;  %v30_v1 = vld [vmem:[%s521_s1] sm:$0xff]  ;;  %v16_v4 = vld [vmem:[%s522_s0 + $0x10] sm:$0xff] }
   0x2   :  { %95 = vmatpush.msra.mxu0 %v31_v0  ;;  %v14_v2 = vld [vmem:[%s522_s0] sm:$0xff]  ;;  %333 = vmatpush.msra.mxu3 %v31_v0  ;;  %v15_v3 = vld [vmem:[%s522_s0 + $0x8] sm:$0xff]  ;;  %v17_v5 = vld [vmem:[%s522_s0 + $0x18] sm:$0xff] }
   0x3   :  { %v18_v6 = vld [vmem:[%s522_s0 + $0x20] sm:$0xff]  ;;  %v23_v7 = vld [vmem:[%s522_s0 + $0x48] sm:$0xff]  ;;  %v24_v9 = vld [vmem:[%s522_s0 + $0x50] sm:$0xff] }
   0x4   :  { %96 = vmatpush.msra.mxu0 %v30_v1  ;;  %334 = vmatpush.msra.mxu3 %v30_v1  ;;  %v19_v8 = vld [vmem:[%s522_s0 + $0x28] sm:$0xff]  ;;  %v20_v10 = vld [vmem:[%s522_s0 + $0x30] sm:$0xff]  ;;  %v25_v11 = vld [vmem:[%s522_s0 + $0x58] sm:$0xff] }
   0x5   :  { %301 = vmatmul.msk.f32.vlgmr.msra.gmra.mxu0 %vm32_vm0, %v14_v2  ;;  %310 = vmatmul.msk.f32.vlgmr.msra.gmra.mxu3 %vm32_vm0, %v23_v7  ;;  %v149_v12 = vld [vmem:[%s523_s2 + $0x18] sm:$0xff]  ;;  %v148_v13 = vld [vmem:[%s523_s2 + $0x10] sm:$0xff]  ;;  %v147_v14 = vld [vmem:[%s523_s2 + $0x8] sm:$0xff] }
   0x6   :  { %211 = vmatpush.msra.mxu1 %v149_v12  ;;  %335 = vmatpush.msra.mxu2 %v149_v12  ;;  %v21_v15 = vld [vmem:[%s522_s0 + $0x38] sm:$0xff]  ;;  %v26_v16 = vld [vmem:[%s522_s0 + $0x60] sm:$0xff]  ;;  %v27_v18 = vld [vmem:[%s522_s0 + $0x68] sm:$0xff] }
   0x7   :  { %v22_v17 = vld [vmem:[%s522_s0 + $0x40] sm:$0xff]  ;;  %v28_v19 = vld [vmem:[%s522_s0 + $0x70] sm:$0xff]  ;;  %v29_v20 = vld [vmem:[%s522_s0 + $0x78] sm:$0xff] }
   0x8   :  { %212 = vmatpush.msra.mxu1 %v148_v13  ;;  %336 = vmatpush.msra.mxu2 %v148_v13  ;;  %v146_v21 = vld [vmem:[%s523_s2] sm:$0xff] }
   0xa   :  { %213 = vmatpush.msra.mxu1 %v147_v14  ;;  %337 = vmatpush.msra.mxu2 %v147_v14 }
   0xc   :  { %214 = vmatpush.msra.mxu1 %v146_v21  ;;  %338 = vmatpush.msra.mxu2 %v146_v21 }
   0xd   :  { %302 = vmatmul.msk.f32.gmra.mxu0 %vm32_vm0, %v15_v3  ;;  %311 = vmatmul.msk.f32.gmra.mxu3 %vm32_vm0, %v24_v9 }
  0x15   :  { %303 = vmatmul.msk.f32.gmra.mxu0 %vm32_vm0, %v16_v4  ;;  %312 = vmatmul.msk.f32.gmra.mxu3 %vm32_vm0, %v25_v11 }
  0x1d   :  { %304 = vmatmul.msk.f32.gmra.mxu0 %vm32_vm0, %v17_v5  ;;  %313 = vmatmul.msk.f32.gmra.mxu3 %vm32_vm0, %v26_v16 }
  0x25   :  { %305 = vmatmul.msk.f32.gmra.mxu0 %vm32_vm0, %v18_v6  ;;  %314 = vmatmul.msk.f32.gmra.mxu3 %vm32_vm0, %v27_v18 }
  0x2d   :  { %306 = vmatmul.msk.f32.gmra.mxu0 %vm32_vm0, %v19_v8  ;;  %315 = vmatmul.msk.f32.gmra.mxu3 %vm32_vm0, %v28_v19 }
  0x35   :  { %307 = vmatmul.msk.f32.gmra.mxu0 %vm32_vm0, %v20_v10  ;;  %316 = vmatmul.msk.f32.gmra.mxu3 %vm32_vm0, %v29_v20 }
  0x3d   :  { %308 = vmatmul.msk.f32.gmra.mxu0 %vm32_vm0, %v21_v15 }
  0x45   :  { %309 = vmatmul.msk.f32.gmra.mxu0 %vm32_vm0, %v22_v17 }
  0x82   :  { %v98_v22 = vpop.f32.mrf.mxu0 }
  0x83   :  { %317 = vmatmul.msk.f32.vlgmr.msra.gmra.mxu1 %vm150_vm1, %v98_v22 }
  0x88   :  { %v125_v30 = vpop.f32.mrf.mxu3 }
  0x8a   :  { %v101_v23 = vpop.f32.mrf.mxu0 }
  0x8b   :  { %318 = vmatmul.msk.f32.gmra.mxu1 %vm150_vm1, %v101_v23 }
  0x90   :  { %v128_v32 = vpop.f32.mrf.mxu3 }
  0x92   :  { %v104_v24 = vpop.f32.mrf.mxu0 }
  0x93   :  { %319 = vmatmul.msk.f32.gmra.mxu1 %vm150_vm1, %v104_v24 }
  0x98   :  { %v131_v33 = vpop.f32.mrf.mxu3 }
  0x9a   :  { %v107_v25 = vpop.f32.mrf.mxu0 }
  0x9b   :  { %320 = vmatmul.msk.f32.gmra.mxu1 %vm150_vm1, %v107_v25 }
  0xa0   :  { %v134_v34 = vpop.f32.mrf.mxu3 }
  0xa2   :  { %v110_v26 = vpop.f32.mrf.mxu0 }
  0xa3   :  { %321 = vmatmul.msk.f32.gmra.mxu1 %vm150_vm1, %v110_v26 }
  0xa8   :  { %v137_v35 = vpop.f32.mrf.mxu3 }
  0xaa   :  { %v113_v27 = vpop.f32.mrf.mxu0 }
  0xab   :  { %322 = vmatmul.msk.f32.gmra.mxu1 %vm150_vm1, %v113_v27 }
  0xb0   :  { %v140_v36 = vpop.f32.mrf.mxu3 }
  0xb2   :  { %v116_v28 = vpop.f32.mrf.mxu0 }
  0xb3   :  { %323 = vmatmul.msk.f32.gmra.mxu1 %vm150_vm1, %v116_v28 }
  0xb8   :  { %v143_v37 = vpop.f32.mrf.mxu3 }
  0xba   :  { %v119_v29 = vpop.f32.mrf.mxu0 }
  0xbb   :  { %324 = vmatmul.msk.f32.gmra.mxu1 %vm150_vm1, %v119_v29 }
  0xc2   :  { %v122_v31 = vpop.f32.mrf.mxu0 }
  0xc3   :  { %325 = vmatmul.msk.f32.vlgmr.msra.gmra.mxu2 %vm150_vm1, %v122_v31 }
  0xcb   :  { %326 = vmatmul.msk.f32.gmra.mxu2 %vm150_vm1, %v125_v30 }
  0xd3   :  { %327 = vmatmul.msk.f32.gmra.mxu2 %vm150_vm1, %v128_v32 }
  0xdb   :  { %328 = vmatmul.msk.f32.gmra.mxu2 %vm150_vm1, %v131_v33 }
  0xe3   :  { %329 = vmatmul.msk.f32.gmra.mxu2 %vm150_vm1, %v134_v34 }
  0xeb   :  { %330 = vmatmul.msk.f32.gmra.mxu2 %vm150_vm1, %v137_v35 }
  0xf3   :  { %331 = vmatmul.msk.f32.gmra.mxu2 %vm150_vm1, %v140_v36 }
  0xfb   :  { %332 = vmatmul.msk.f32.gmra.mxu2 %vm150_vm1, %v143_v37 }
 0x100   :  { %v216_v38 = vpop.f32.mrf.mxu1 }
 0x101   :  { %v264_v39 = vpack.c.bf16 %v216_v38, %v216_v38 }
 0x103   :  { %281 = vst.msk [vmem:[%s524_s3] sm:$0xf] %vm280_vm2, %v264_v39 }
 0x108   :  { %v219_v40 = vpop.f32.mrf.mxu1 }
 0x109   :  { %v265_v41 = vpack.c.bf16 %v219_v40, %v219_v40 }
 0x10b   :  { %282 = vst.msk [vmem:[%s524_s3 + $0x4] sm:$0xf] %vm280_vm2, %v265_v41 }
 0x110   :  { %v222_v42 = vpop.f32.mrf.mxu1 }
 0x111   :  { %v266_v43 = vpack.c.bf16 %v222_v42, %v222_v42 }
 0x113   :  { %283 = vst.msk [vmem:[%s524_s3 + $0x8] sm:$0xf] %vm280_vm2, %v266_v43 }
 0x118   :  { %v225_v44 = vpop.f32.mrf.mxu1 }
 0x119   :  { %v267_v45 = vpack.c.bf16 %v225_v44, %v225_v44 }
 0x11b   :  { %284 = vst.msk [vmem:[%s524_s3 + $0xc] sm:$0xf] %vm280_vm2, %v267_v45 }
 0x120   :  { %v228_v46 = vpop.f32.mrf.mxu1 }
 0x121   :  { %v268_v47 = vpack.c.bf16 %v228_v46, %v228_v46 }
 0x123   :  { %285 = vst.msk [vmem:[%s524_s3 + $0x10] sm:$0xf] %vm280_vm2, %v268_v47 }
 0x128   :  { %v231_v48 = vpop.f32.mrf.mxu1 }
 0x129   :  { %v269_v49 = vpack.c.bf16 %v231_v48, %v231_v48 }
 0x12b   :  { %286 = vst.msk [vmem:[%s524_s3 + $0x14] sm:$0xf] %vm280_vm2, %v269_v49 }
 0x130   :  { %v234_v50 = vpop.f32.mrf.mxu1 }
 0x131   :  { %v270_v51 = vpack.c.bf16 %v234_v50, %v234_v50 }
 0x133   :  { %287 = vst.msk [vmem:[%s524_s3 + $0x18] sm:$0xf] %vm280_vm2, %v270_v51 }
 0x138   :  { %v237_v52 = vpop.f32.mrf.mxu1 }
 0x139   :  { %v271_v53 = vpack.c.bf16 %v237_v52, %v237_v52 }
 0x13b   :  { %288 = vst.msk [vmem:[%s524_s3 + $0x1c] sm:$0xf] %vm280_vm2, %v271_v53 }
 0x146   :  { %v240_v54 = vpop.f32.mrf.mxu2 }
 0x147   :  { %v272_v55 = vpack.c.bf16 %v240_v54, %v240_v54 }
 0x149   :  { %289 = vst.msk [vmem:[%s524_s3 + $0x20] sm:$0xf] %vm280_vm2, %v272_v55 }
 0x14e   :  { %v243_v56 = vpop.f32.mrf.mxu2 }
 0x14f   :  { %v273_v57 = vpack.c.bf16 %v243_v56, %v243_v56 }
 0x151   :  { %290 = vst.msk [vmem:[%s524_s3 + $0x24] sm:$0xf] %vm280_vm2, %v273_v57 }
 0x156   :  { %v246_v58 = vpop.f32.mrf.mxu2 }
 0x157   :  { %v274_v59 = vpack.c.bf16 %v246_v58, %v246_v58 }
 0x159   :  { %291 = vst.msk [vmem:[%s524_s3 + $0x28] sm:$0xf] %vm280_vm2, %v274_v59 }
 0x15e   :  { %v249_v60 = vpop.f32.mrf.mxu2 }
 0x15f   :  { %v275_v61 = vpack.c.bf16 %v249_v60, %v249_v60 }
 0x161   :  { %292 = vst.msk [vmem:[%s524_s3 + $0x2c] sm:$0xf] %vm280_vm2, %v275_v61 }
 0x166   :  { %v252_v62 = vpop.f32.mrf.mxu2 }
 0x167   :  { %v276_v63 = vpack.c.bf16 %v252_v62, %v252_v62 }
 0x169   :  { %293 = vst.msk [vmem:[%s524_s3 + $0x30] sm:$0xf] %vm280_vm2, %v276_v63 }
 0x16e   :  { %v255_v0 = vpop.f32.mrf.mxu2 }
 0x16f   :  { %v277_v1 = vpack.c.bf16 %v255_v0, %v255_v0 }
 0x171   :  { %294 = vst.msk [vmem:[%s524_s3 + $0x34] sm:$0xf] %vm280_vm2, %v277_v1 }
 0x176   :  { %v258_v2 = vpop.f32.mrf.mxu2 }
 0x177   :  { %v278_v3 = vpack.c.bf16 %v258_v2, %v258_v2 }
 0x179   :  { %295 = vst.msk [vmem:[%s524_s3 + $0x38] sm:$0xf] %vm280_vm2, %v278_v3 }
 0x17e   :  { %v261_v4 = vpop.f32.mrf.mxu2 }
 0x17f   :  { %v279_v5 = vpack.c.bf16 %v261_v4, %v261_v4 }
 0x181   :  { %296 = vst.msk [vmem:[%s524_s3 + $0x3c] sm:$0xf] %vm280_vm2, %v279_v5 }

</bundles_post_ra>
